<compile_context>
chip_gen: v5e
topology: v5e:2x2
jax: 0.10.0
libtpu: 0.0.40
codegen_flags: <defaults>
</compile_context>

<pallas_src>
import math

import jax
import jax.numpy as jnp
import numpy as np
from jax import lax
from jax.experimental import pallas as pl
from jax.experimental.pallas import tpu as pltpu

K = 3
STRIDE = 2
PAD = 1
OUT_PAD = 1


def _split(k):
    """3x3 kernel index -> (output parity d, input shift s) for stride 2."""
    if k == 0:
        return 1, 1
    if k == 1:
        return 0, 0
    return 1, 0                              # k == 2


def _upsample_kernel(x_ref, xh_ref, we_ref, wo_ref, b_ref, o_ref):
    """One grid step = one (image, row-tile).

    x_ref  : (1, th, W+1, Cin)   bf16  input rows [r*th, r*th+th), +1 col pad
    xh_ref : (1, 1,  W+1, Cin)   bf16  halo row r*th+th (zero pad row at bottom)
    we_ref : (4*Cin, 2*Cout)     bf16  phase-packed weights, even output rows
    wo_ref : (4*Cin, 2*Cout)     bf16  phase-packed weights, odd  output rows
    b_ref  : (1, 2*Cout)         f32   bias tiled over the column parity
    o_ref  : (1, th, 2, W, 2*Cout) bf16  output block [i, dr, j, (dc, co)]
    """
    _, th, wp1, cin = x_ref.shape
    w = wp1 - 1
    two_cout = o_ref.shape[-1]

    xm = x_ref[0]                                   # (th, W+1, Cin)
    xh = xh_ref[0]                                  # (1,  W+1, Cin)
    x_lo = xm                                       # input rows r+i     (sh=0)
    x_hi = jnp.concatenate([xm[1:], xh], axis=0)    # input rows r+i+1   (sh=1)

    # 4 shift views packed along channels in s = 2*sh + sw order (VMEM only).
    views = []
    for src in (x_lo, x_hi):                        # sh = 0, 1
        for sw in (0, 1):                           # sw = 0, 1
            views.append(src[:, sw:sw + w, :])
    x4 = jnp.concatenate(views, axis=-1).reshape(th * w, 4 * cin)

    bias = b_ref[...]                               # (1, 2*Cout) f32
    r_even = jnp.dot(x4, we_ref[...], preferred_element_type=jnp.float32) + bias
    r_odd = jnp.dot(x4, wo_ref[...], preferred_element_type=jnp.float32) + bias

    # dr = 0 / 1 output-row parities; (j, dc, co) is already in NHWC flat order.
    o_ref[0, :, 0, :, :] = r_even.reshape(th, w, two_cout).astype(o_ref.dtype)
    o_ref[0, :, 1, :, :] = r_odd.reshape(th, w, two_cout).astype(o_ref.dtype)


def _pick_tile_rows(H, W, Cin, Cout, N, requested=None):
    """Rows per grid step, derived from a per-chip-safe VMEM budget."""
    if requested is None:
        row_in = 2 * (W + 1) * Cin * 2                       # x tile, 2 bufs, bf16
        row_out = 2 * (2 * W * 2 * Cout) * 2                 # out tile, 2 bufs, bf16
        row_tmp = 3 * W * 4 * Cin * 2 + 2 * W * 2 * Cout * 4  # shifts/X4 + f32 accums
        fixed = (2 * 2 * (4 * Cin) * (2 * Cout) * 2          # w_even+w_odd, 2 bufs
                 + 4 * (W + 1) * Cin * 2 + 8 * Cout)
        budget = 20 * 1024 * 1024        # under the scoped default on v5e/v6e/v7x
        th = (budget - fixed) // max(row_in + row_out + row_tmp, 1)
        th = max(8, th)
    else:
        th = int(requested)
    th = int(max(2, min(th, H)))
    if N == 1 and H >= 4:                # keep >= 2 grid steps for v7x megacore
        th = max(2, min(th, (H + 1) // 2))
    return th


def conv_transpose2d_pallas(x_nchw, weight, bias, *, tile_rows=None):
    """PyTorch-equivalent ConvTranspose2d(k=3, s=2, p=1, output_padding=1).

    x_nchw: (N, Cin, H, W)   weight: (Cin, Cout, 3, 3)   bias: (Cout,)
    returns: (N, Cout, 2H, 2W) float32
    """
    N, Cin, H, W = x_nchw.shape
    Cout = weight.shape[1]
    OH, OW = STRIDE * H, STRIDE * W

    th = _pick_tile_rows(H, W, Cin, Cout, N, tile_rows)
    num_r = -(-H // th)
    H_t = num_r * th

    # ---- input glue: cast to bf16 FIRST, then NHWC + zero pad (row & col) ---
    x_nhwc = jnp.transpose(x_nchw.astype(jnp.bfloat16), (0, 2, 3, 1))
    x_pad = jnp.pad(x_nhwc, ((0, 0), (0, H_t + 1 - H), (0, 1), (0, 0)))
    # x_pad: (N, H_t+1, W+1, Cin)

    # ---- phase-packed weights, split by output-row parity dr ----------------
    w_f32 = weight.astype(jnp.float32)
    w_pack = jnp.zeros((2, 4, Cin, 2, Cout), jnp.float32)    # [dr, s, ci, dc, co]
    for kh in range(K):
        for kw in range(K):
            dr, sh = _split(kh)
            dc, sw = _split(kw)
            s = 2 * sh + sw
            w_pack = w_pack.at[dr, s, :, dc, :].set(w_f32[:, :, kh, kw])
    w_even = w_pack[0].reshape(4 * Cin, 2 * Cout).astype(jnp.bfloat16)
    w_odd = w_pack[1].reshape(4 * Cin, 2 * Cout).astype(jnp.bfloat16)
    bias2 = jnp.tile(bias.astype(jnp.float32).reshape(1, Cout), (1, 2))  # (1, 2Cout)

    # ---- VMEM + cost bookkeeping --------------------------------------------
    in_bytes = x_pad.size * 2 + N * num_r * (W + 1) * Cin * 2
    w_bytes = 2 * (4 * Cin) * (2 * Cout) * 2 + 2 * Cout * 4
    out_bytes = N * num_r * th * 2 * W * 2 * Cout * 2
    vmem_est = (2 * th * (W + 1) * Cin * 2 + 2 * (W + 1) * Cin * 2
                + 2 * w_bytes + 2 * th * 2 * W * 2 * Cout * 2
                + 3 * th * W * 4 * Cin * 2 + 2 * th * W * 2 * Cout * 4)
    vmem_limit = int(min(max(2 * vmem_est, 32 * 1024 * 1024), 48 * 1024 * 1024))

    out5 = pl.pallas_call(
        _upsample_kernel,
        out_shape=jax.ShapeDtypeStruct((N * num_r, th, 2, W, 2 * Cout),
                                       jnp.bfloat16),
        grid_spec=pltpu.PrefetchScalarGridSpec(
            num_scalar_prefetch=0,
            grid=(N, num_r),
            in_specs=[
                # row tile (contiguous DMA)
                pl.BlockSpec((1, th, W + 1, Cin), lambda n, r: (n, r, 0, 0)),
                # 1-row halo just below the tile (row (r+1)*th of the padded img)
                pl.BlockSpec((1, 1, W + 1, Cin),
                             lambda n, r: (n, (r + 1) * th, 0, 0)),
                # resident weights & bias (constant index maps -> no re-DMA)
                pl.BlockSpec((4 * Cin, 2 * Cout), lambda n, r: (0, 0)),
                pl.BlockSpec((4 * Cin, 2 * Cout), lambda n, r: (0, 0)),
                pl.BlockSpec((1, 2 * Cout), lambda n, r: (0, 0)),
            ],
            out_specs=pl.BlockSpec(
                (1, th, 2, W, 2 * Cout),
                lambda n, r: (n * num_r + r, 0, 0, 0, 0)),
        ),
        compiler_params=pltpu.CompilerParams(
            dimension_semantics=("parallel", "parallel"),
            vmem_limit_bytes=vmem_limit,
        ),
        cost_estimate=pl.CostEstimate(
            flops=int(2 * N * H_t * W * (4 * Cin) * (4 * Cout)),
            transcendentals=0,
            bytes_accessed=int(in_bytes + w_bytes + out_bytes),
        ),
    )(x_pad, x_pad, w_even, w_odd, bias2)

    # Free reshape to NHWC; the only remaining glue is the NCHW transpose the
    # PyTorch API requires (fused with the H_t->H trim and the f32 upcast).
    out_nhwc = out5.reshape(N, 2 * H_t, 2 * W, Cout)[:, :OH]
    return jnp.transpose(out_nhwc, (0, 3, 1, 2)).astype(jnp.float32)


def conv_transpose2d_ref(x_nchw, weight, bias):
    """Pure-JAX reference (XLA conv) for the same PyTorch semantics."""
    w_oihw = jnp.transpose(weight, (1, 0, 2, 3))[:, :, ::-1, ::-1]
    out = lax.conv_general_dilated(
        x_nchw.astype(jnp.float32), w_oihw.astype(jnp.float32),
        window_strides=(1, 1),
        padding=((K - 1 - PAD, K - 1 - PAD + OUT_PAD),
                 (K - 1 - PAD, K - 1 - PAD + OUT_PAD)),
        lhs_dilation=(STRIDE, STRIDE),
        dimension_numbers=('NCHW', 'OIHW', 'NCHW'))
    return out + bias.astype(jnp.float32)[None, :, None, None]


if __name__ == "__main__":
    N, Cin, Cout, H, W = 2, 4, 8, 16, 16

    key = jax.random.PRNGKey(0)
    kx, kw, kb = jax.random.split(key, 3)

    x = jax.random.normal(kx, (N, Cin, H, W), dtype=jnp.float32)
    # PyTorch ConvTranspose2d weight shape: (in_channels, out_channels, kH, kW)
    fan = Cin * K * K
    bound = 1.0 / math.sqrt(fan)
    weight = jax.random.uniform(kw, (Cin, Cout, K, K), jnp.float32, -bound, bound)
    bias = jax.random.uniform(kb, (Cout,), jnp.float32, -bound, bound)

    # tile_rows=8 -> 2 row tiles per image, grid (2, 2): exercises the halo
    # BlockSpec and the software pipeline even at this small test size.
    fwd = jax.jit(lambda a, w, b: conv_transpose2d_pallas(a, w, b, tile_rows=8))
    out = jax.block_until_ready(fwd(x, weight, bias))
    ref = jax.block_until_ready(conv_transpose2d_ref(x, weight, bias))

    assert out.shape == (N, Cout, STRIDE * H, STRIDE * W), out.shape
    # bf16 operands + bf16 output store with f32 MXU accumulation.
    np.testing.assert_allclose(np.asarray(out), np.asarray(ref),
                               rtol=3e-2, atol=3e-2)
    print("KERNEL_OK")
</pallas_src>

<mosaic_0001>
module attributes {stable_mosaic.version = 11 : i64} {
  func.func @_upsample_kernel(%arg0: i32, %arg1: i32, %arg2: memref<1x8x17x4xbf16, #tpu.memory_space<vmem>>, %arg3: memref<1x1x17x4xbf16, #tpu.memory_space<vmem>>, %arg4: memref<16x16xbf16, #tpu.memory_space<vmem>>, %arg5: memref<16x16xbf16, #tpu.memory_space<vmem>>, %arg6: memref<1x16xf32, #tpu.memory_space<vmem>>, %arg7: memref<1x8x2x16x16xbf16, #tpu.memory_space<vmem>>) attributes {dimension_semantics = [#tpu.dimension_semantics<parallel>, #tpu.dimension_semantics<parallel>], iteration_bounds = array<i64: 2, 2>, scalar_prefetch = 0 : i64, scratch_operands = 0 : i64, tpu.core_type = #tpu.core_type<tc>, window_params = [{transform_indices = @transform_0, window_bounds = array<i64: 1, 8, 17, 4>}, {transform_indices = @transform_1, window_bounds = array<i64: 1, 1, 17, 4>}, {pipeline_mode = #tpu.pipeline_mode<synchronous>, transform_indices = @transform_2, window_bounds = array<i64: 16, 16>}, {pipeline_mode = #tpu.pipeline_mode<synchronous>, transform_indices = @transform_3, window_bounds = array<i64: 16, 16>}, {pipeline_mode = #tpu.pipeline_mode<synchronous>, transform_indices = @transform_4, window_bounds = array<i64: 1, 16>}, {transform_indices = @transform_5, window_bounds = array<i64: 1, 8, 2, 16, 16>}]} {
    %c0 = arith.constant 0 : index
    %c0_0 = arith.constant 0 : index
    %c0_1 = arith.constant 0 : index
    %c0_2 = arith.constant 0 : index
    %0 = vector.load %arg2[%c0, %c0_0, %c0_1, %c0_2] : memref<1x8x17x4xbf16, #tpu.memory_space<vmem>>, vector<1x8x17x4xbf16>
    %1 = vector.shape_cast %0 : vector<1x8x17x4xbf16> to vector<8x17x4xbf16>
    %c0_3 = arith.constant 0 : index
    %c0_4 = arith.constant 0 : index
    %c0_5 = arith.constant 0 : index
    %c0_6 = arith.constant 0 : index
    %2 = vector.load %arg3[%c0_3, %c0_4, %c0_5, %c0_6] : memref<1x1x17x4xbf16, #tpu.memory_space<vmem>>, vector<1x1x17x4xbf16>
    %3 = vector.shape_cast %2 : vector<1x1x17x4xbf16> to vector<1x17x4xbf16>
    %4 = vector.extract_strided_slice %1 {offsets = [1, 0, 0], sizes = [7, 17, 4], strides = [1, 1, 1]} : vector<8x17x4xbf16> to vector<7x17x4xbf16>
    %5 = tpu.concatenate %4, %3 in 0 : vector<7x17x4xbf16>, vector<1x17x4xbf16> -> vector<8x17x4xbf16>
    %6 = vector.extract_strided_slice %1 {offsets = [0, 0, 0], sizes = [8, 16, 4], strides = [1, 1, 1]} : vector<8x17x4xbf16> to vector<8x16x4xbf16>
    %7 = vector.extract_strided_slice %1 {offsets = [0, 1, 0], sizes = [8, 16, 4], strides = [1, 1, 1]} : vector<8x17x4xbf16> to vector<8x16x4xbf16>
    %8 = vector.extract_strided_slice %5 {offsets = [0, 0, 0], sizes = [8, 16, 4], strides = [1, 1, 1]} : vector<8x17x4xbf16> to vector<8x16x4xbf16>
    %9 = vector.extract_strided_slice %5 {offsets = [0, 1, 0], sizes = [8, 16, 4], strides = [1, 1, 1]} : vector<8x17x4xbf16> to vector<8x16x4xbf16>
    %10 = tpu.concatenate %6, %7, %8, %9 in 2 : vector<8x16x4xbf16>, vector<8x16x4xbf16>, vector<8x16x4xbf16>, vector<8x16x4xbf16> -> vector<8x16x16xbf16>
    %11 = vector.shape_cast %10 : vector<8x16x16xbf16> to vector<128x16xbf16>
    %c0_7 = arith.constant 0 : index
    %c0_8 = arith.constant 0 : index
    %12 = vector.load %arg6[%c0_7, %c0_8] : memref<1x16xf32, #tpu.memory_space<vmem>>, vector<1x16xf32>
    %c0_9 = arith.constant 0 : index
    %c0_10 = arith.constant 0 : index
    %13 = vector.load %arg4[%c0_9, %c0_10] : memref<16x16xbf16, #tpu.memory_space<vmem>>, vector<16x16xbf16>
    %cst = arith.constant dense<0.000000e+00> : vector<128x16xf32>
    %14 = tpu.matmul %11, %13, %cst {dimension_numbers = #tpu.dot_dimension_numbers<[1], [0], [0], [1], [0, 0, 1, 1], [], []>} : vector<128x16xbf16>, vector<16x16xbf16>, vector<128x16xf32> -> vector<128x16xf32>
    %15 = vector.broadcast %12 : vector<1x16xf32> to vector<128x16xf32>
    %16 = arith.addf %14, %15 : vector<128x16xf32>
    %c0_11 = arith.constant 0 : index
    %c0_12 = arith.constant 0 : index
    %17 = vector.load %arg5[%c0_11, %c0_12] : memref<16x16xbf16, #tpu.memory_space<vmem>>, vector<16x16xbf16>
    %cst_13 = arith.constant dense<0.000000e+00> : vector<128x16xf32>
    %18 = tpu.matmul %11, %17, %cst_13 {dimension_numbers = #tpu.dot_dimension_numbers<[1], [0], [0], [1], [0, 0, 1, 1], [], []>} : vector<128x16xbf16>, vector<16x16xbf16>, vector<128x16xf32> -> vector<128x16xf32>
    %19 = vector.broadcast %12 : vector<1x16xf32> to vector<128x16xf32>
    %20 = arith.addf %18, %19 : vector<128x16xf32>
    %21 = vector.shape_cast %16 : vector<128x16xf32> to vector<8x16x16xf32>
    %22 = arith.truncf %21 : vector<8x16x16xf32> to vector<8x16x16xbf16>
    %c0_14 = arith.constant 0 : index
    %c0_15 = arith.constant 0 : index
    %c0_16 = arith.constant 0 : index
    %c0_17 = arith.constant 0 : index
    %c0_18 = arith.constant 0 : index
    %23 = vector.load %arg7[%c0_14, %c0_15, %c0_16, %c0_17, %c0_18] : memref<1x8x2x16x16xbf16, #tpu.memory_space<vmem>>, vector<1x8x1x16x16xbf16>
    %24 = vector.shape_cast %23 : vector<1x8x1x16x16xbf16> to vector<8x16x16xbf16>
    %25 = vector.shape_cast %22 : vector<8x16x16xbf16> to vector<1x8x1x16x16xbf16>
    tpu.vector_store %arg7[%c0_14, %c0_15, %c0_16, %c0_17, %c0_18], %25 {strides = array<i32>} : memref<1x8x2x16x16xbf16, #tpu.memory_space<vmem>>, vector<1x8x1x16x16xbf16>,
    %26 = vector.shape_cast %20 : vector<128x16xf32> to vector<8x16x16xf32>
    %27 = arith.truncf %26 : vector<8x16x16xf32> to vector<8x16x16xbf16>
    %c0_19 = arith.constant 0 : index
    %c0_20 = arith.constant 0 : index
    %c1 = arith.constant 1 : index
    %c0_21 = arith.constant 0 : index
    %c0_22 = arith.constant 0 : index
    %28 = vector.load %arg7[%c0_19, %c0_20, %c1, %c0_21, %c0_22] : memref<1x8x2x16x16xbf16, #tpu.memory_space<vmem>>, vector<1x8x1x16x16xbf16>
    %29 = vector.shape_cast %28 : vector<1x8x1x16x16xbf16> to vector<8x16x16xbf16>
    %30 = vector.shape_cast %27 : vector<8x16x16xbf16> to vector<1x8x1x16x16xbf16>
    tpu.vector_store %arg7[%c0_19, %c0_20, %c1, %c0_21, %c0_22], %30 {strides = array<i32>} : memref<1x8x2x16x16xbf16, #tpu.memory_space<vmem>>, vector<1x8x1x16x16xbf16>,
    return
  }
  func.func @transform_0(%arg0: i32, %arg1: i32) -> (i32, i32, i32, i32) {
    %c0_i32 = arith.constant 0 : i32
    %c0_i32_0 = arith.constant 0 : i32
    %c0_i32_1 = arith.constant 0 : i32
    return %arg0, %arg1, %c0_i32, %c0_i32_0 : i32, i32, i32, i32
  }
  func.func @transform_1(%arg0: i32, %arg1: i32) -> (i32, i32, i32, i32) {
    %c1_i32 = arith.constant 1 : i32
    %0 = arith.addi %arg1, %c1_i32 : i32
    %c8_i32 = arith.constant 8 : i32
    %1 = arith.muli %0, %c8_i32 : i32
    %c0_i32 = arith.constant 0 : i32
    %c0_i32_0 = arith.constant 0 : i32
    %c0_i32_1 = arith.constant 0 : i32
    return %arg0, %1, %c0_i32, %c0_i32_0 : i32, i32, i32, i32
  }
  func.func @transform_2(%arg0: i32, %arg1: i32) -> (i32, i32) {
    %c0_i32 = arith.constant 0 : i32
    %c0_i32_0 = arith.constant 0 : i32
    %c0_i32_1 = arith.constant 0 : i32
    return %c0_i32, %c0_i32_0 : i32, i32
  }
  func.func @transform_3(%arg0: i32, %arg1: i32) -> (i32, i32) {
    %c0_i32 = arith.constant 0 : i32
    %c0_i32_0 = arith.constant 0 : i32
    %c0_i32_1 = arith.constant 0 : i32
    return %c0_i32, %c0_i32_0 : i32, i32
  }
  func.func @transform_4(%arg0: i32, %arg1: i32) -> (i32, i32) {
    %c0_i32 = arith.constant 0 : i32
    %c0_i32_0 = arith.constant 0 : i32
    %c0_i32_1 = arith.constant 0 : i32
    return %c0_i32, %c0_i32_0 : i32, i32
  }
  func.func @transform_5(%arg0: i32, %arg1: i32) -> (i32, i32, i32, i32, i32) {
    %c2_i32 = arith.constant 2 : i32
    %0 = arith.muli %arg0, %c2_i32 : i32
    %1 = arith.addi %0, %arg1 : i32
    %c0_i32 = arith.constant 0 : i32
    %c0_i32_0 = arith.constant 0 : i32
    %c0_i32_1 = arith.constant 0 : i32
    %c0_i32_2 = arith.constant 0 : i32
    %c0_i32_3 = arith.constant 0 : i32
    return %1, %c0_i32, %c0_i32_0, %c0_i32_1, %c0_i32_2 : i32, i32, i32, i32, i32
  }
}

</mosaic_0001>

<bundles_post_ra>
// kernel: _lambda_.1
= control target key start
LH: loop header
LB: loop body
LE: loop exit
PB: predicated region body
PF: predicated region fallthrough
CT: control target
= control target key end

     0   :  { %s1185_s18 = smov 0   ;;  %s1187_s19 = smov 0   ;;  %s1511_s0 = inlined_call_operand.vmem [shape: bf16[2,17,17,4], index: 0, kind: input, shape index: {}, may-alias: {0,1}]   ;;  %s1512_s1 = inlined_call_operand.vmem [shape: bf16[2,17,17,4], index: 1, kind: input, shape index: {}, may-alias: {0,1}]   ;;  %s1513_s2 = inlined_call_operand.vmem [shape: bf16[16,16], index: 2, kind: input, shape index: {}]   ;;  %s1514_s3 = inlined_call_operand.vmem [shape: bf16[16,16], index: 3, kind: input, shape index: {}]   ;;  %s1515_s4 = inlined_call_operand.vmem [shape: f32[1,16], index: 4, kind: input, shape index: {}]   ;;  %s1516_s5 = inlined_call_operand.vmem [shape: bf16[4,8,2,16,16], index: 5, kind: output, shape index: {}]  }
   0x1   :  { %s1189_s20 = smov 0   ;;  %s1191_s21 = smov 0  }
   0x2   :  { %s1193_s22 = smov 0  }
   0x3 LB: > { %s24_s23 = sadd.s32 1, %s1142_s20  ;;  %s27_s24 = sadd.s32 1, %s1146_s21  ;;  %s1150_s22 = sphi %s1193_s22, %s15_s22   ;;  %s1146_s21 = sphi %s1191_s21, %s1520_s21   ;;  %s1142_s20 = sphi %s1189_s20, %s1519_s20   ;;  %s1138_s19 = sphi %s1187_s19, %s1518_s19   ;;  %s1134_s18 = sphi %s1185_s18, %s1517_s18  }
   0x4   : > { %p25_p0 = scmp.ge.s32.totalorder %s24_s23, 2  ;;  %p959_p1 = scmp.ge.s32.totalorder %s1150_s22, 1 }
   0x5   : > { %p245_p2 = scmp.lt.s32.totalorder %s1150_s22, 5 }
   0x6   : > { %s1522_s23 = smov (%p25_p0, %s24_s23), 0  ;;  %s1524_s24 = smov (!%p25_p0, %s27_s24), %s1146_s21 }
   0x7   : > { %p246_p3 = pnand %p959_p1, %p245_p2  ;;  %p29_p4 = scmp.ge.s32.totalorder %s1524_s24, 2 }
   0x8   : > { %s1220_s25 = sshll.u32 (!%p246_p3), %s1134_s18, 3  ;;  %p302_p5 = scmp.lt.s32.totalorder (!%p246_p3), %s1138_s19, 1 }
   0x9   : > { %s1526_s24 = smov (%p29_p4, %s1524_s24), 0  ;;  %249 = sbr.rel (%p246_p3) target bundleno = 352 (0x160), region = 40 }
   0xa   : > { %p304_p6 = scmp.lt.s32.totalorder (!%p246_p3), %s1220_s25, 16  ;;  %s1152_s10 = smov (!%p246_p3), 8  }
   0xb   : > { %s1153_s11 = smov (!%p246_p3), 12   ;;  %s1154_s12 = smov (!%p246_p3), 4  }
   0xc   : > { %s1050_s13 = sadd.s32 (!%p246_p3), 8, %s1220_s25 }
   0xd   : > { %p321_p7 = scmp.lt.s32.totalorder (!%p246_p3), %s1050_s13, 16 }
   0xe   : > { %s1225_s26 = scalar_select %p302_p5, %s1138_s19, 1  ;;  %vm431_vm0 = vsmask.f32 7424  ;;  %vm596_vm1 = vcmask 31744   ;;  %vm613_vm2 = vcmask 64512   ;;  %vm630_vm3 = vcmask 97280  }
   0xf   : > { %s305_s27 = scalar_select %p304_p6, %s1220_s25, 16  ;;  %vm659_vm4 = vcmask 130048   ;;  %vm798_vm5 = vcmask 125952  }
  0x10   : > { %s1066_s28 = smul.u32 51, %s1225_s26  ;;  %s1528_s13 = smov (!%p321_p7, %s1050_s13), 16 }
  0x11   : > { %s1065_s29 = smul.u32 3, %s305_s27 }
  0x12   : > { %s1067_s14 = smul.u32 3, %s1528_s13 }
  0x13   : > { %s308_s30 = sadd.s32 %s1066_s28, %s1065_s29 }
  0x14   : > { %s961_s6 = sshll.u32 %s308_s30, 2  ;;  %s325_s15 = sadd.s32 %s1067_s14, %s1066_s28 }
  0x15   : > { %s1234_s9 = scalar_lea.vmem %s1511_s0, %s961_s6  ;;  %s963_s16 = sshll.u32 %s325_s15, 2 }
  0x16   : > { %v1237_v0 = vld [vmem:[%s1234_s9 + $0x3c] sm:$0xff]  ;;  %v357_v1 = vld [vmem:[%s1234_s9 + $0x44] sm:$0x1]  ;;  %v1241_v2 = vld [vmem:[%s1234_s9 + $0x30] sm:$0xff]  ;;  %s327_s26 = scalar_lea.vmem %s1512_s1, %s963_s16  ;;  %s964_s6 = sshll.u32 %s1138_s19, 1 }
  0x17   : > { %v420_v3 = vunpack.c.l.b16 %v357_v1  ;;  %v354_v4 = vld [vmem:[%s1234_s9 + $0x38] sm:$0x1]  ;;  %v1245_v5 = vld [vmem:[%s1234_s9] sm:$0xff]  ;;  %v342_v6 = vld [vmem:[%s1234_s9 + $0x8] sm:$0x1]  ;;  %v493_v7 = vshrl.u32 %v1237_v0, 16  ;;  %s331_s7 = sadd.s32 %s1134_s18, %s964_s6 }
  0x18   : > { %v495_v8 = vshll.u32 %v1237_v0, 16  ;;  %v419_v9 = vunpack.c.l.b16 %v354_v4  ;;  %v481_v10 = vshrl.u32 %v1241_v2, 16  ;;  %v1252_v11 = vld [vmem:[%s1234_s9 + $0xc] sm:$0xff]  ;;  %v483_v13 = vshll.u32 %v1241_v2, 16  ;;  %v345_v16 = vld [vmem:[%s1234_s9 + $0x14] sm:$0x1] }
  0x19   : > { %v428_v12 = vpack.c.b16 %v420_v3, %v420_v3  ;;  %v415_v14 = vunpack.c.l.b16 %v342_v6  ;;  %v433_v15 = vshrl.u32 %v1245_v5, 16  ;;  %v435_v19 = vshll.u32 %v1245_v5, 16  ;;  %549 = vrot.lane.b32.xlu2 %v1252_v11, %s1152_s10  ;;  %v360_v25 = vld [vmem:[%s1234_s9 + $0x50] sm:$0x1]  ;;  %v1264_v35 = vld [vmem:[%s1234_s9 + $0x48] sm:$0xff]  ;;  %v1279_v53 = vld [vmem:[%s1234_s9 + $0x18] sm:$0xff] }
  0x1a   : > { %v497_v17 = vrot.slane %v495_v8, 1  ;;  %v427_v18 = vpack.c.b16 %v419_v9, %v419_v9  ;;  %v416_v20 = vunpack.c.l.b16 %v345_v16  ;;  %v485_v22 = vrot.slane %v483_v13, 1  ;;  %v348_v40 = vld [vmem:[%s1234_s9 + $0x20] sm:$0x1]  ;;  %v363_v59 = vld [vmem:[%s1234_s9 + $0x5c] sm:$0x1] }
  0x1b   : > { %v500_v21 = vshll.u32 %v428_v12, 16  ;;  %v423_v23 = vpack.c.b16 %v415_v14, %v415_v14  ;;  %v445_v24 = vshrl.u32 %v1252_v11, 16  ;;  %v437_v28 = vrot.slane %v435_v19, 1  ;;  %v1292_v3 = vld [vmem:[%s1234_s9 + $0x54] sm:$0xff]  ;;  %v351_v9 = vld [vmem:[%s1234_s9 + $0x2c] sm:$0x1] }
  0x1c   : > { %v498_v26 = vor.u32 %v497_v17, %v493_v7  ;;  %v488_v27 = vshll.u32 %v427_v18, 16  ;;  %v424_v29 = vpack.c.b16 %v416_v20, %v416_v20  ;;  %v486_v31 = vor.u32 %v485_v22, %v481_v10  ;;  %v1305_v16 = vld [vmem:[%s1234_s9 + $0x24] sm:$0xff]  ;;  %p332_p8 = scmp.lt.s32.totalorder %s331_s7, 3 }
  0x1d   : > { %v502_v30 = vrot.slane %v500_v21, 1  ;;  %v440_v32 = vshll.u32 %v423_v23, 16  ;;  %v447_v33 = vshll.u32 %v1252_v11, 16  ;;  %v421_v37 = vunpack.c.l.b16 %v360_v25  ;;  %v366_v21 = vld [vmem:[%s327_s26 + $0x8] sm:$0x1] }
  0x1e   : > { %v490_v34 = vrot.slane %v488_v27, 1  ;;  %v452_v36 = vshll.u32 %v424_v29, 16  ;;  %v507_v44 = vshll.u32 %v1264_v35, 16  ;;  %v438_v45 = vor.u32 %v437_v28, %v433_v15  ;;  %s1530_s7 = smov (!%p332_p8, %s331_s7), 3 }
  0x1f   : > { %v503_v38 = vsel %vm431_vm0, %v498_v26, %v502_v30  ;;  %v449_v39 = vrot.slane %v447_v33, 1  ;;  %v429_v43 = vpack.c.b16 %v421_v37, %v421_v37  ;;  %v442_v46 = vrot.slane %v440_v32, 1 }
  0x20   : > { %588 = vrot.lane.b32.xlu1 %v503_v38, %s1153_s11  ;;  %v1270_v41 = vsel %vm431_vm0, %v486_v31, %v490_v34  ;;  %v454_v42 = vrot.slane %v452_v36, 1  ;;  %v417_v48 = vunpack.c.l.b16 %v348_v40  ;;  %v505_v50 = vshrl.u32 %v1264_v35, 16  ;;  %v1061_v40 = vld [vmem:[%s1513_s2] sm:$0xff] }
  0x21   : > { %536 = vrot.lane.b32.xlu0 %v1270_v41, %s1154_s12  ;;  %v450_v47 = vor.u32 %v449_v39, %v445_v24  ;;  %v509_v51 = vrot.slane %v507_v44, 1  ;;  %v512_v52 = vshll.u32 %v429_v43, 16  ;;  %v443_v54 = vsel %vm431_vm0, %v438_v45, %v442_v46  ;;  %v1060_v24 = vld [vmem:[%s327_s26] sm:$0xff]  ;;  %1063 = vmatpush.bf16.msra.mxu2 %v1061_v40 }
  0x22   : > { %v425_v55 = vpack.c.b16 %v417_v48, %v417_v48  ;;  %v459_v56 = vshll.u32 %v1279_v53, 16  ;;  %v457_v60 = vshrl.u32 %v1279_v53, 16  ;;  %v422_v1 = vunpack.c.l.b16 %v363_v59  ;;  %683 = vmatpush.bf16.msra.mxu0 %v1061_v40 }
  0x23   : > { %v455_v49 = vsel %vm431_vm0, %v450_v47, %v454_v42  ;;  %v510_v57 = vor.u32 %v509_v51, %v505_v50  ;;  %v514_v58 = vrot.slane %v512_v52, 1  ;;  %v519_v8 = vshll.u32 %v1292_v3, 16  ;;  %v1062_v42 = vld [vmem:[%s1514_s3] sm:$0xff] }
  0x24   : > { %580 = vrot.lane.b32.xlu2 %v455_v49, %s1153_s11  ;;  %v461_v61 = vrot.slane %v459_v56, 1  ;;  %v464_v62 = vshll.u32 %v425_v55, 16  ;;  %v430_v7 = vpack.c.b16 %v422_v1, %v422_v1  ;;  %v517_v12 = vshrl.u32 %v1292_v3, 16  ;;  %1064 = vmatpush.bf16.msra.mxu3 %v1062_v42 }
  0x25   : > { %v515_v63 = vsel %vm431_vm0, %v510_v57, %v514_v58  ;;  %v521_v13 = vrot.slane %v519_v8, 1  ;;  %v418_v15 = vunpack.c.l.b16 %v351_v9  ;;  %v471_v20 = vshll.u32 %v1305_v16, 16  ;;  %740 = vmatpush.bf16.msra.mxu1 %v1062_v42 }
  0x26   : > { %v462_v4 = vor.u32 %v461_v61, %v457_v60  ;;  %v466_v6 = vrot.slane %v464_v62, 1  ;;  %v524_v14 = vshll.u32 %v430_v7, 16  ;;  %v566_v22 = vunpack.c.l.b16 %v366_v21 }
  0x27   : > { %v522_v17 = vor.u32 %v521_v13, %v517_v12  ;;  %v426_v19 = vpack.c.b16 %v418_v15, %v418_v15  ;;  %v469_v25 = vshrl.u32 %v1305_v16, 16  ;;  %v473_v26 = vrot.slane %v471_v20, 1 }
  0x28   : > { %528 = vrot.lane.b32.xlu1 %v443_v54, %s1154_s12  ;;  %v467_v10 = vsel %vm431_vm0, %v462_v4, %v466_v6  ;;  %v526_v18 = vrot.slane %v524_v14, 1  ;;  %v571_v28 = vshll.u32 %v1060_v24, 16  ;;  %v567_v29 = vpack.c.b16 %v566_v22, %v566_v22 }
  0x29   : > { %557 = vrot.lane.b32.xlu0 %v1237_v0, %s1152_s10  ;;  %v476_v27 = vshll.u32 %v426_v19, 16  ;;  %v474_v30 = vor.u32 %v473_v26, %v469_v25  ;;  %v569_v32 = vshrl.u32 %v1060_v24, 16 }
  0x2a   : > { %v527_v23 = vsel %vm431_vm0, %v522_v17, %v526_v18  ;;  %v573_v33 = vrot.slane %v571_v28, 1  ;;  %v576_v34 = vshll.u32 %v567_v29, 16 }
  0x2b   : > { %v478_v31 = vrot.slane %v476_v27, 1 }
  0x2c   : > { %590 = vrot.lane.b32.xlu2 %v515_v63, %s1153_s11  ;;  %v574_v37 = vor.u32 %v573_v33, %v569_v32 }
  0x2d   : > { %v479_v36 = vsel %vm431_vm0, %v474_v30, %v478_v31 }
  0x30   : > { %559 = vrot.lane.b32.xlu1 %v1264_v35, %s1152_s10 }
  0x31   : > { %538 = vrot.lane.b32.xlu0 %v503_v38, %s1154_s12  ;;  %v578_v38 = vrot.slane %v576_v34, 1 }
  0x33   : > { %v579_v39 = vsel %vm431_vm0, %v574_v37, %v578_v38 }
  0x34   : > { %582 = vrot.lane.b32.xlu2 %v467_v10, %s1153_s11 }
  0x38   : > { %551 = vrot.lane.b32.xlu1 %v1279_v53, %s1152_s10 }
  0x39   : > { %530 = vrot.lane.b32.xlu0 %v455_v49, %s1154_s12 }
  0x3c   : > { %592 = vrot.lane.b32.xlu2 %v527_v23, %s1153_s11 }
  0x40   : > { %561 = vrot.lane.b32.xlu1 %v1292_v3, %s1152_s10 }
  0x41   : > { %540 = vrot.lane.b32.xlu0 %v515_v63, %s1154_s12 }
  0x44   : > { %584 = vrot.lane.b32.xlu2 %v479_v36, %s1153_s11 }
  0x48   : > { %553 = vrot.lane.b32.xlu1 %v1305_v16, %s1152_s10 }
  0x49   : > { %532 = vrot.lane.b32.xlu0 %v467_v10, %s1154_s12 }
  0x4c   : > { %594 = vrot.lane.b32.xlu2 %v579_v39, %s1153_s11 }
  0x50   : > { %563 = vrot.lane.b32.xlu1 %v1060_v24, %s1152_s10 }
  0x51   : > { %542 = vrot.lane.b32.xlu0 %v527_v23, %s1154_s12 }
  0x54   : > { %586 = vrot.lane.b32.xlu2 %v1270_v41, %s1153_s11 }
  0x58   : > { %555 = vrot.lane.b32.xlu1 %v1241_v2, %s1152_s10  ;;  %s1051_s10 = sshll.u32 %s1530_s7, 7 }
  0x59   : > { %534 = vrot.lane.b32.xlu0 %v479_v36, %s1154_s12  ;;  %s1400_s13 = scalar_lea.vmem %s1516_s5, %s1051_s10 }
  0x73   : > { %v550_v43 = vpop.permute.xlu2 %549 }
  0x7e   : > { %v581_v44 = vpop.permute.xlu2 %580 }
  0x86   : > { %v591_v46 = vpop.permute.xlu2 %590 }
  0x92   : > { %v589_v41 = vpop.permute.xlu1 %588 }
  0x93   : > { %v537_v45 = vpop.permute.xlu0 %536 }
  0x94   : > { %v606_v48 = vsel %vm596_vm1, %v1241_v2, %v537_v45 }
  0x9a   : > { %v529_v47 = vpop.permute.xlu1 %528 }
  0x9b   : > { %v558_v49 = vpop.permute.xlu0 %557  ;;  %v598_v50 = vsel %vm596_vm1, %v1245_v5, %v529_v47  ;;  %v583_v5 = vpop.permute.xlu2 %582 }
  0x9c   : > { %v623_v51 = vsel %vm613_vm2, %v606_v48, %v558_v49  ;;  %v615_v52 = vsel %vm613_vm2, %v598_v50, %v550_v43 }
  0x9d   : > { %v640_v54 = vsel %vm630_vm3, %v623_v51, %v589_v41  ;;  %v632_v55 = vsel %vm630_vm3, %v615_v52, %v581_v44 }
  0x9e   : > { %1011 = vmatmul.msk.bf16.vlgmr.msra.gmra.mxu2 %vm659_vm4, %v640_v54  ;;  %1023 = vmatmul.msk.bf16.vlgmr.msra.gmra.mxu3 %vm659_vm4, %v640_v54 }
  0x9f   : > { %1007 = vmatmul.msk.bf16.vlgmr.msra.gmra.mxu0 %vm659_vm4, %v632_v55  ;;  %1019 = vmatmul.msk.bf16.vlgmr.msra.gmra.mxu1 %vm659_vm4, %v632_v55 }
  0xa2   : > { %v560_v2 = vpop.permute.xlu1 %559 }
  0xa3   : > { %v539_v56 = vpop.permute.xlu0 %538  ;;  %v593_v1 = vpop.permute.xlu2 %592 }
  0xa4   : > { %v608_v57 = vsel %vm596_vm1, %v1237_v0, %v539_v56 }
  0xa5   : > { %v625_v58 = vsel %vm613_vm2, %v608_v57, %v560_v2 }
  0xa6   : > { %v642_v63 = vsel %vm630_vm3, %v625_v58, %v591_v46 }
  0xaa   : > { %v552_v59 = vpop.permute.xlu1 %551 }
  0xab   : > { %v531_v60 = vpop.permute.xlu0 %530  ;;  %v585_v7 = vpop.permute.xlu2 %584 }
  0xac   : > { %v600_v61 = vsel %vm596_vm1, %v1252_v11, %v531_v60 }
  0xad   : > { %v617_v62 = vsel %vm613_vm2, %v600_v61, %v552_v59 }
  0xae   : > { %1012 = vmatmul.msk.bf16.gmra.mxu2 %vm659_vm4, %v642_v63  ;;  %1024 = vmatmul.msk.bf16.gmra.mxu3 %vm659_vm4, %v642_v63  ;;  %v634_v4 = vsel %vm630_vm3, %v617_v62, %v583_v5 }
  0xaf   : > { %1008 = vmatmul.msk.bf16.gmra.mxu0 %vm659_vm4, %v634_v4  ;;  %1020 = vmatmul.msk.bf16.gmra.mxu1 %vm659_vm4, %v634_v4 }
  0xb2   : > { %v562_v0 = vpop.permute.xlu1 %561 }
  0xb3   : > { %v541_v6 = vpop.permute.xlu0 %540 }
  0xb4   : > { %v610_v11 = vsel %vm596_vm1, %v1264_v35, %v541_v6  ;;  %v595_v35 = vpop.permute.xlu2 %594 }
  0xb5   : > { %v627_v8 = vsel %vm613_vm2, %v610_v11, %v562_v0 }
  0xb6   : > { %v644_v14 = vsel %vm630_vm3, %v627_v8, %v593_v1 }
  0xba   : > { %v554_v9 = vpop.permute.xlu1 %553 }
  0xbb   : > { %v533_v10 = vpop.permute.xlu0 %532 }
  0xbc   : > { %v602_v12 = vsel %vm596_vm1, %v1279_v53, %v533_v10  ;;  %v587_v22 = vpop.permute.xlu2 %586 }
  0xbd   : > { %v619_v13 = vsel %vm613_vm2, %v602_v12, %v554_v9 }
  0xbe   : > { %1013 = vmatmul.msk.bf16.gmra.mxu2 %vm659_vm4, %v644_v14  ;;  %1025 = vmatmul.msk.bf16.gmra.mxu3 %vm659_vm4, %v644_v14  ;;  %v636_v15 = vsel %vm630_vm3, %v619_v13, %v585_v7 }
  0xbf   : > { %1009 = vmatmul.msk.bf16.gmra.mxu0 %vm659_vm4, %v636_v15  ;;  %1021 = vmatmul.msk.bf16.gmra.mxu1 %vm659_vm4, %v636_v15 }
  0xc2   : > { %v564_v17 = vpop.permute.xlu1 %563 }
  0xc3   : > { %v543_v18 = vpop.permute.xlu0 %542 }
  0xc4   : > { %v612_v53 = vsel %vm596_vm1, %v1292_v3, %v543_v18  ;;  %v1393_v3 = vld [vmem:[%s1515_s4] ss:$0 sm:$0xff] }
  0xc5   : > { %v629_v19 = vsel %vm613_vm2, %v612_v53, %v564_v17 }
  0xc6   : > { %v646_v25 = vsel %vm630_vm3, %v629_v19, %v595_v35 }
  0xca   : > { %v556_v20 = vpop.permute.xlu1 %555 }
  0xcb   : > { %v535_v21 = vpop.permute.xlu0 %534 }
  0xcc   : > { %v604_v23 = vsel %vm596_vm1, %v1305_v16, %v535_v21 }
  0xcd   : > { %v621_v24 = vsel %vm613_vm2, %v604_v23, %v556_v20 }
  0xce   : > { %1014 = vmatmul.msk.bf16.gmra.mxu2 %vm659_vm4, %v646_v25  ;;  %1026 = vmatmul.msk.bf16.gmra.mxu3 %vm659_vm4, %v646_v25  ;;  %v638_v26 = vsel %vm630_vm3, %v621_v24, %v587_v22 }
  0xcf   : > { %1010 = vmatmul.msk.bf16.gmra.mxu0 %vm659_vm4, %v638_v26  ;;  %1022 = vmatmul.msk.bf16.gmra.mxu1 %vm659_vm4, %v638_v26 }
 0x11c   : > { %v685_v16 = vpop.f32.mrf.mxu0  ;;  %v742_v27 = vpop.f32.mrf.mxu1 }
 0x11d   : > { %v686_v28 = vadd.f32 %v1393_v3, %v685_v16  ;;  %v743_v29 = vadd.f32 %v1393_v3, %v742_v27 }
 0x11f   : > { %v782_v30 = vpack.c.bf16 %v686_v28, %v686_v28  ;;  %v815_v31 = vpack.c.bf16 %v743_v29, %v743_v29 }
 0x121   : > { %799 = vst.msk [vmem:[%s1400_s13] sm:$0xf] %vm798_vm5, %v782_v30  ;;  %v705_v32 = vpop.f32.mrf.mxu2  ;;  %v762_v33 = vpop.f32.mrf.mxu3 }
 0x122   : > { %1027 = vst.msk [vmem:[%s1400_s13 + $0x8] sm:$0xf] %vm798_vm5, %v815_v31  ;;  %v706_v34 = vadd.f32 %v1393_v3, %v705_v32  ;;  %v763_v36 = vadd.f32 %v1393_v3, %v762_v33 }
 0x124   : > { %v790_v37 = vpack.c.bf16 %v706_v34, %v706_v34  ;;  %v823_v38 = vpack.c.bf16 %v763_v36, %v763_v36  ;;  %v687_v39 = vpop.f32.mrf.mxu0  ;;  %v744_v40 = vpop.f32.mrf.mxu1 }
 0x125   : > { %v688_v42 = vadd.f32 %v1393_v3, %v687_v39  ;;  %v745_v43 = vadd.f32 %v1393_v3, %v744_v40 }
 0x126   : > { %807 = vst.msk [vmem:[%s1400_s13 + $0x40] sm:$0xf] %vm798_vm5, %v790_v37 }
 0x127   : > { %1035 = vst.msk [vmem:[%s1400_s13 + $0x48] sm:$0xf] %vm798_vm5, %v823_v38  ;;  %v783_v44 = vpack.c.bf16 %v688_v42, %v688_v42  ;;  %v816_v41 = vpack.c.bf16 %v745_v43, %v745_v43 }
 0x129   : > { %800 = vst.msk [vmem:[%s1400_s13 + $0x4] sm:$0xf] %vm798_vm5, %v783_v44  ;;  %v707_v45 = vpop.f32.mrf.mxu2  ;;  %v764_v46 = vpop.f32.mrf.mxu3 }
 0x12a   : > { %1028 = vst.msk [vmem:[%s1400_s13 + $0xc] sm:$0xf] %vm798_vm5, %v816_v41  ;;  %v708_v47 = vadd.f32 %v1393_v3, %v707_v45  ;;  %v765_v48 = vadd.f32 %v1393_v3, %v764_v46 }
 0x12c   : > { %v791_v49 = vpack.c.bf16 %v708_v47, %v708_v47  ;;  %v824_v50 = vpack.c.bf16 %v765_v48, %v765_v48  ;;  %v690_v51 = vpop.f32.mrf.mxu0  ;;  %v747_v52 = vpop.f32.mrf.mxu1 }
 0x12d   : > { %v691_v54 = vadd.f32 %v1393_v3, %v690_v51  ;;  %v748_v55 = vadd.f32 %v1393_v3, %v747_v52 }
 0x12e   : > { %808 = vst.msk [vmem:[%s1400_s13 + $0x44] sm:$0xf] %vm798_vm5, %v791_v49 }
 0x12f   : > { %1036 = vst.msk [vmem:[%s1400_s13 + $0x4c] sm:$0xf] %vm798_vm5, %v824_v50  ;;  %v784_v2 = vpack.c.bf16 %v691_v54, %v691_v54  ;;  %v817_v56 = vpack.c.bf16 %v748_v55, %v748_v55 }
 0x131   : > { %801 = vst.msk [vmem:[%s1400_s13 + $0x10] sm:$0xf] %vm798_vm5, %v784_v2  ;;  %v710_v5 = vpop.f32.mrf.mxu2  ;;  %v767_v57 = vpop.f32.mrf.mxu3 }
 0x132   : > { %1029 = vst.msk [vmem:[%s1400_s13 + $0x18] sm:$0xf] %vm798_vm5, %v817_v56  ;;  %v711_v58 = vadd.f32 %v1393_v3, %v710_v5  ;;  %v768_v59 = vadd.f32 %v1393_v3, %v767_v57 }
 0x134   : > { %v792_v60 = vpack.c.bf16 %v711_v58, %v711_v58  ;;  %v825_v61 = vpack.c.bf16 %v768_v59, %v768_v59  ;;  %v692_v62 = vpop.f32.mrf.mxu0  ;;  %v749_v63 = vpop.f32.mrf.mxu1 }
 0x135   : > { %v693_v1 = vadd.f32 %v1393_v3, %v692_v62  ;;  %v750_v4 = vadd.f32 %v1393_v3, %v749_v63 }
 0x136   : > { %809 = vst.msk [vmem:[%s1400_s13 + $0x50] sm:$0xf] %vm798_vm5, %v792_v60 }
 0x137   : > { %1037 = vst.msk [vmem:[%s1400_s13 + $0x58] sm:$0xf] %vm798_vm5, %v825_v61  ;;  %v785_v0 = vpack.c.bf16 %v693_v1, %v693_v1  ;;  %v818_v6 = vpack.c.bf16 %v750_v4, %v750_v4 }
 0x139   : > { %802 = vst.msk [vmem:[%s1400_s13 + $0x14] sm:$0xf] %vm798_vm5, %v785_v0  ;;  %v712_v11 = vpop.f32.mrf.mxu2  ;;  %v769_v7 = vpop.f32.mrf.mxu3 }
 0x13a   : > { %1030 = vst.msk [vmem:[%s1400_s13 + $0x1c] sm:$0xf] %vm798_vm5, %v818_v6  ;;  %v713_v8 = vadd.f32 %v1393_v3, %v712_v11  ;;  %v770_v9 = vadd.f32 %v1393_v3, %v769_v7 }
 0x13c   : > { %v793_v10 = vpack.c.bf16 %v713_v8, %v713_v8  ;;  %v826_v12 = vpack.c.bf16 %v770_v9, %v770_v9  ;;  %v695_v13 = vpop.f32.mrf.mxu0  ;;  %v752_v14 = vpop.f32.mrf.mxu1 }
 0x13d   : > { %v696_v15 = vadd.f32 %v1393_v3, %v695_v13  ;;  %v753_v35 = vadd.f32 %v1393_v3, %v752_v14 }
 0x13e   : > { %810 = vst.msk [vmem:[%s1400_s13 + $0x54] sm:$0xf] %vm798_vm5, %v793_v10 }
 0x13f   : > { %1038 = vst.msk [vmem:[%s1400_s13 + $0x5c] sm:$0xf] %vm798_vm5, %v826_v12  ;;  %v786_v17 = vpack.c.bf16 %v696_v15, %v696_v15  ;;  %v819_v18 = vpack.c.bf16 %v753_v35, %v753_v35 }
 0x141   : > { %803 = vst.msk [vmem:[%s1400_s13 + $0x20] sm:$0xf] %vm798_vm5, %v786_v17  ;;  %v715_v53 = vpop.f32.mrf.mxu2  ;;  %v772_v19 = vpop.f32.mrf.mxu3 }
 0x142   : > { %1031 = vst.msk [vmem:[%s1400_s13 + $0x28] sm:$0xf] %vm798_vm5, %v819_v18  ;;  %v716_v20 = vadd.f32 %v1393_v3, %v715_v53  ;;  %v773_v21 = vadd.f32 %v1393_v3, %v772_v19 }
 0x144   : > { %v794_v22 = vpack.c.bf16 %v716_v20, %v716_v20  ;;  %v827_v23 = vpack.c.bf16 %v773_v21, %v773_v21  ;;  %v697_v24 = vpop.f32.mrf.mxu0  ;;  %v754_v25 = vpop.f32.mrf.mxu1 }
 0x145   : > { %v698_v26 = vadd.f32 %v1393_v3, %v697_v24  ;;  %v755_v16 = vadd.f32 %v1393_v3, %v754_v25 }
 0x146   : > { %811 = vst.msk [vmem:[%s1400_s13 + $0x60] sm:$0xf] %vm798_vm5, %v794_v22 }
 0x147   : > { %1039 = vst.msk [vmem:[%s1400_s13 + $0x68] sm:$0xf] %vm798_vm5, %v827_v23  ;;  %v787_v27 = vpack.c.bf16 %v698_v26, %v698_v26  ;;  %v820_v28 = vpack.c.bf16 %v755_v16, %v755_v16 }
 0x149   : > { %804 = vst.msk [vmem:[%s1400_s13 + $0x24] sm:$0xf] %vm798_vm5, %v787_v27  ;;  %v717_v29 = vpop.f32.mrf.mxu2  ;;  %v774_v30 = vpop.f32.mrf.mxu3 }
 0x14a   : > { %1032 = vst.msk [vmem:[%s1400_s13 + $0x2c] sm:$0xf] %vm798_vm5, %v820_v28  ;;  %v718_v31 = vadd.f32 %v1393_v3, %v717_v29  ;;  %v775_v32 = vadd.f32 %v1393_v3, %v774_v30 }
 0x14c   : > { %v795_v33 = vpack.c.bf16 %v718_v31, %v718_v31  ;;  %v828_v34 = vpack.c.bf16 %v775_v32, %v775_v32  ;;  %v700_v36 = vpop.f32.mrf.mxu0  ;;  %v757_v37 = vpop.f32.mrf.mxu1 }
 0x14d   : > { %v701_v38 = vadd.f32 %v1393_v3, %v700_v36  ;;  %v758_v39 = vadd.f32 %v1393_v3, %v757_v37 }
 0x14e   : > { %812 = vst.msk [vmem:[%s1400_s13 + $0x64] sm:$0xf] %vm798_vm5, %v795_v33 }
 0x14f   : > { %1040 = vst.msk [vmem:[%s1400_s13 + $0x6c] sm:$0xf] %vm798_vm5, %v828_v34  ;;  %v788_v40 = vpack.c.bf16 %v701_v38, %v701_v38  ;;  %v821_v42 = vpack.c.bf16 %v758_v39, %v758_v39 }
 0x151   : > { %805 = vst.msk [vmem:[%s1400_s13 + $0x30] sm:$0xf] %vm798_vm5, %v788_v40  ;;  %v720_v43 = vpop.f32.mrf.mxu2  ;;  %v777_v44 = vpop.f32.mrf.mxu3 }
 0x152   : > { %1033 = vst.msk [vmem:[%s1400_s13 + $0x38] sm:$0xf] %vm798_vm5, %v821_v42  ;;  %v721_v41 = vadd.f32 %v1393_v3, %v720_v43  ;;  %v778_v45 = vadd.f32 %v1393_v3, %v777_v44 }
 0x154   : > { %v796_v46 = vpack.c.bf16 %v721_v41, %v721_v41  ;;  %v829_v47 = vpack.c.bf16 %v778_v45, %v778_v45  ;;  %v702_v48 = vpop.f32.mrf.mxu0  ;;  %v759_v49 = vpop.f32.mrf.mxu1 }
 0x155   : > { %v703_v50 = vadd.f32 %v1393_v3, %v702_v48  ;;  %v760_v51 = vadd.f32 %v1393_v3, %v759_v49 }
 0x156   : > { %813 = vst.msk [vmem:[%s1400_s13 + $0x70] sm:$0xf] %vm798_vm5, %v796_v46 }
 0x157   : > { %1041 = vst.msk [vmem:[%s1400_s13 + $0x78] sm:$0xf] %vm798_vm5, %v829_v47  ;;  %v789_v52 = vpack.c.bf16 %v703_v50, %v703_v50  ;;  %v822_v54 = vpack.c.bf16 %v760_v51, %v760_v51 }
 0x159   : > { %806 = vst.msk [vmem:[%s1400_s13 + $0x34] sm:$0xf] %vm798_vm5, %v789_v52  ;;  %v722_v55 = vpop.f32.mrf.mxu2  ;;  %v779_v2 = vpop.f32.mrf.mxu3 }
 0x15a   : > { %1034 = vst.msk [vmem:[%s1400_s13 + $0x3c] sm:$0xf] %vm798_vm5, %v822_v54  ;;  %v723_v56 = vadd.f32 %v1393_v3, %v722_v55  ;;  %v780_v5 = vadd.f32 %v1393_v3, %v779_v2 }
 0x15c   : > { %v797_v57 = vpack.c.bf16 %v723_v56, %v723_v56  ;;  %v830_v58 = vpack.c.bf16 %v780_v5, %v780_v5 }
 0x15e   : > { %814 = vst.msk [vmem:[%s1400_s13 + $0x74] sm:$0xf] %vm798_vm5, %v797_v57 }
 0x15f   : > { %1042 = vst.msk [vmem:[%s1400_s13 + $0x7c] sm:$0xf] %vm798_vm5, %v830_v58 }
 0x160 PF: > { %s15_s22 = sadd.s32 1, %s1150_s22   ;;  %s1517_s18 = smov %s1142_s20 }
 0x161   : > { %p12_p9 = scmp.ge.s32.totalorder %s15_s22, 6   ;;  %s1518_s19 = smov %s1146_s21 }
 0x162   : > { %s1519_s20 = smov %s1522_s23  ;;  %s1520_s21 = smov %s1526_s24 }
 0x163   :  { %14 = sbr.rel (!%p12_p9) target bundleno = 3 (0x3), region = 74 }

</bundles_post_ra>
